<compile_context>
chip_gen: v7x
topology: tpu7x:2x2x1
jax: 0.10.0
libtpu: 0.0.40
codegen_flags: <defaults>
</compile_context>

<pallas_src>
import numpy as np
import jax
import jax.numpy as jnp
from jax.experimental import pallas as pl
from jax.experimental.pallas import tpu as pltpu

# ----------------------------- problem sizes --------------------------------
N, CIN, H, W = 2, 4, 16, 16          # input  (NCHW)
CB = 8                               # backbone output channels
NC = 3                               # num classes
KH = KW = 3                          # backbone conv kernel
STRIDE = 2
OHF, OWF = H // STRIDE, W // STRIDE  # backbone feature-map spatial (8, 8)
K1 = KH * KW * CIN                   # raw im2col contraction size (36)
K1P = 40                             # padded: K1 + 1 (ones/bias row) -> mult of 8
CBP = 16                             # padded: CB + 1 (bias carrier)  -> mult of 8
M_FEAT = OHF * OWF                   # pixels per image at feature res (64)
M_OUT = H * W                        # pixels per image at input res  (256)


# ------------------------- bilinear (align_corners=False) -------------------
def _bilinear_1d_matrix(out_size: int, in_size: int) -> np.ndarray:
    """W[o, i] so that out = W @ in reproduces torch bilinear, align_corners=False."""
    o = np.arange(out_size, dtype=np.float64)
    src = (o + 0.5) * (in_size / out_size) - 0.5
    src = np.maximum(src, 0.0)                       # PyTorch clamps negatives
    i0 = np.minimum(np.floor(src).astype(np.int64), in_size - 1)
    i1 = np.minimum(i0 + 1, in_size - 1)
    lam = src - i0
    mat = np.zeros((out_size, in_size), dtype=np.float32)
    mat[np.arange(out_size), i0] += (1.0 - lam).astype(np.float32)
    mat[np.arange(out_size), i1] += lam.astype(np.float32)
    return mat


# ------------------------------ config ---------------------------------------
def _pick_config():
    """(batch_block, operand_dtype) chosen per TPU generation."""
    kind = ""
    try:
        kind = jax.devices()[0].device_kind.lower()
    except Exception:
        pass
    is_v7 = "v7" in kind
    is_v6 = "v6" in kind
    # v7x: 2 TensorCores -> keep a parallel batch grid (one image per core).
    # v5e/v6e: single TC -> fold the batch into one invocation (no grid overhead).
    bb = 1 if is_v7 else N
    # bf16 operands (f32 accumulation) run at full MXU rate on v6e/v7x.
    dt = jnp.bfloat16 if (is_v6 or is_v7) else jnp.float32
    return bb, dt


# ------------------------------ Pallas kernel --------------------------------
def _make_kernel(bb):
    def kernel(p_ref, w1_ref, w2_ref, wup_ref, o_ref):
        # p_ref  : (bb, K1P, M_FEAT)  transposed im2col patches (+ ones / zero rows)
        # w1_ref : (CBP, K1P)         backbone weight^T, conv bias folded (col K1)
        # w2_ref : (NC, CBP)          classifier weight^T, bias folded (col CB)
        # wup_ref: (M_FEAT, M_OUT)    transposed bilinear upsample matrix
        # o_ref  : (bb, NC, M_OUT)    NCHW-flattened logits (lane-dense last dim)
        w1 = w1_ref[...]
        w2 = w2_ref[...]
        wup = wup_ref[...]
        for b in range(bb):                                   # static unroll (1 or 2)
            p = p_ref[b]                                      # (K1P, M_FEAT)
            h = jnp.dot(w1, p, preferred_element_type=jnp.float32)   # conv + b1
            h = jnp.maximum(h, 0.0).astype(p.dtype)           # ReLU (carrier row -> 1)
            y = jnp.dot(w2, h, preferred_element_type=jnp.float32)   # 1x1 conv + b2
            y = y.astype(p.dtype)                             # (NC, M_FEAT)
            o_ref[b] = jnp.dot(y, wup,
                               preferred_element_type=jnp.float32)   # upsample
    return kernel


def _run_pallas(patches_t, w1a, w2a, wup_t, bb):
    grid_n = N // bb
    return pl.pallas_call(
        _make_kernel(bb),
        out_shape=jax.ShapeDtypeStruct((N, NC, M_OUT), jnp.float32),
        grid_spec=pltpu.PrefetchScalarGridSpec(
            num_scalar_prefetch=0,
            grid=(grid_n,),
            in_specs=[
                pl.BlockSpec((bb, K1P, M_FEAT), lambda n: (n, 0, 0)),
                # Invariant operands: full-array, constant-index blocks.
                pl.BlockSpec((CBP, K1P), lambda n: (0, 0)),
                pl.BlockSpec((NC, CBP), lambda n: (0, 0)),
                pl.BlockSpec((M_FEAT, M_OUT), lambda n: (0, 0)),
            ],
            out_specs=pl.BlockSpec((bb, NC, M_OUT), lambda n: (n, 0, 0)),
        ),
        compiler_params=pltpu.CompilerParams(
            dimension_semantics=("parallel",) if grid_n > 1 else ("arbitrary",)),
    )(patches_t, w1a, w2a, wup_t)


# ------------------------------ JAX glue -------------------------------------
def _im2col_T(x_nhwc, dt):
    """x: (N,H,W,CIN) -> transposed, padded patches (N, K1P, M_FEAT).

    Rows 0..K1-1 ordered (kh, kw, cin); row K1 is all-ones (carries the conv
    bias through the first matmul); remaining rows are zero padding to 40.
    """
    xp = jnp.pad(x_nhwc, ((0, 0), (1, 1), (1, 1), (0, 0)))
    cols = []
    for kh in range(KH):
        for kw in range(KW):
            cols.append(xp[:, kh:kh + 2 * OHF:2, kw:kw + 2 * OWF:2, :])
    patches = jnp.concatenate(cols, axis=-1).reshape(N, M_FEAT, K1)
    p_t = jnp.transpose(patches, (0, 2, 1))                    # (N, K1, M_FEAT)
    ones = jnp.ones((N, 1, M_FEAT), p_t.dtype)
    zeros = jnp.zeros((N, K1P - K1 - 1, M_FEAT), p_t.dtype)
    return jnp.concatenate([p_t, ones, zeros], axis=1).astype(dt)


def _pack_weights(w1, b1, w2, b2, dt):
    """Fold biases into the weights (ones-row trick) and pad to clean tiles."""
    w1_mat = np.asarray(w1).reshape(K1, CB)          # rows ordered (kh, kw, cin)
    w1a = np.zeros((CBP, K1P), np.float32)
    w1a[:CB, :K1] = w1_mat.T
    w1a[:CB, K1] = np.asarray(b1)                    # conv bias * ones-row
    w1a[CB, K1] = 1.0                                # carrier: relu(1)=1 row for b2
    w2a = np.zeros((NC, CBP), np.float32)
    w2a[:, :CB] = np.asarray(w2).T
    w2a[:, CB] = np.asarray(b2)                      # classifier bias * carrier row
    return jnp.asarray(w1a, dt), jnp.asarray(w2a, dt)


def simple_segmentation_model(x_nchw, packed, *, bb):
    """Forward pass of _SimpleSegmentationModel. Returns {'out': NCHW logits}."""
    w1a, w2a, wup_t = packed
    x_nhwc = jnp.transpose(x_nchw, (0, 2, 3, 1))               # NCHW -> NHWC (glue)
    p_t = _im2col_T(x_nhwc, w1a.dtype)                         # layout-only glue
    out = _run_pallas(p_t, w1a, w2a, wup_t, bb)                # (N, NC, M_OUT) f32
    return {'out': out.reshape(N, NC, H, W)}                   # already NCHW


# ------------------------------ reference ------------------------------------
def _reference(x_nchw, params):
    w1, b1, w2, b2 = params
    x_nhwc = jnp.transpose(x_nchw, (0, 2, 3, 1))
    feat = jax.lax.conv_general_dilated(
        x_nhwc, w1, window_strides=(STRIDE, STRIDE),
        padding=((1, 1), (1, 1)),
        dimension_numbers=('NHWC', 'HWIO', 'NHWC')) + b1
    feat = jnp.maximum(feat, 0.0)
    y = jnp.einsum('nhwc,ck->nhwk', feat, w2) + b2             # 1x1 conv
    wy = jnp.asarray(_bilinear_1d_matrix(H, OHF))
    wx = jnp.asarray(_bilinear_1d_matrix(W, OWF))
    up = jnp.einsum('yh,nhwk->nywk', wy, y)
    up = jnp.einsum('xw,nywk->nyxk', wx, up)
    return jnp.transpose(up, (0, 3, 1, 2))


# ------------------------------ main ------------------------------------------
if __name__ == "__main__":
    key = jax.random.PRNGKey(0)
    kx, kw1, kb1, kw2, kb2 = jax.random.split(key, 5)

    x = jax.random.normal(kx, (N, CIN, H, W), jnp.float32)            # NCHW input
    w1 = 0.1 * jax.random.normal(kw1, (KH, KW, CIN, CB), jnp.float32) # HWIO
    b1 = 0.1 * jax.random.normal(kb1, (CB,), jnp.float32)
    w2 = 0.1 * jax.random.normal(kw2, (CB, NC), jnp.float32)
    b2 = 0.1 * jax.random.normal(kb2, (NC,), jnp.float32)

    bb, dt = _pick_config()

    # Separable bilinear weights -> one (M_FEAT, M_OUT) transposed Kronecker
    # matrix.  (At real resolutions this would stay as two separable 1-D
    # matmuls inside the kernel instead of a dense Kronecker product.)
    wy = _bilinear_1d_matrix(H, OHF)
    wx = _bilinear_1d_matrix(W, OWF)
    wup_t = jnp.asarray(np.ascontiguousarray(np.kron(wy, wx).T), dt)  # (64, 256)

    w1a, w2a = _pack_weights(w1, b1, w2, b2, dt)

    result = simple_segmentation_model(x, (w1a, w2a, wup_t), bb=bb)
    out = jax.block_until_ready(result['out'])

    ref = jax.block_until_ready(_reference(x, (w1, b1, w2, b2)))
    assert out.shape == (N, NC, H, W), out.shape
    # Tolerance covers the bf16-operand path on v6e/v7x (f32 accumulation).
    np.testing.assert_allclose(np.asarray(out), np.asarray(ref),
                               rtol=2e-2, atol=2e-2)
    print("KERNEL_OK")
</pallas_src>

<mosaic_0001>
module attributes {stable_mosaic.version = 11 : i64} {
  func.func @kernel(%arg0: i32, %arg1: memref<2x40x64xf32, #tpu.memory_space<vmem>>, %arg2: memref<16x40xf32, #tpu.memory_space<vmem>>, %arg3: memref<3x16xf32, #tpu.memory_space<vmem>>, %arg4: memref<64x256xf32, #tpu.memory_space<vmem>>, %arg5: memref<2x3x256xf32, #tpu.memory_space<vmem>>) attributes {dimension_semantics = [#tpu.dimension_semantics<arbitrary>], iteration_bounds = array<i64: 1>, scalar_prefetch = 0 : i64, scratch_operands = 0 : i64, tpu.core_type = #tpu.core_type<tc>, window_params = [{transform_indices = @transform_0, window_bounds = array<i64: 2, 40, 64>}, {pipeline_mode = #tpu.pipeline_mode<synchronous>, transform_indices = @transform_1, window_bounds = array<i64: 16, 40>}, {pipeline_mode = #tpu.pipeline_mode<synchronous>, transform_indices = @transform_2, window_bounds = array<i64: 3, 16>}, {pipeline_mode = #tpu.pipeline_mode<synchronous>, transform_indices = @transform_3, window_bounds = array<i64: 64, 256>}, {transform_indices = @transform_4, window_bounds = array<i64: 2, 3, 256>}]} {
    %c0 = arith.constant 0 : index
    %c0_0 = arith.constant 0 : index
    %0 = vector.load %arg2[%c0, %c0_0] : memref<16x40xf32, #tpu.memory_space<vmem>>, vector<16x40xf32>
    %c0_1 = arith.constant 0 : index
    %c0_2 = arith.constant 0 : index
    %1 = vector.load %arg3[%c0_1, %c0_2] : memref<3x16xf32, #tpu.memory_space<vmem>>, vector<3x16xf32>
    %c0_3 = arith.constant 0 : index
    %c0_4 = arith.constant 0 : index
    %2 = vector.load %arg4[%c0_3, %c0_4] : memref<64x256xf32, #tpu.memory_space<vmem>>, vector<64x256xf32>
    %c0_5 = arith.constant 0 : index
    %c0_6 = arith.constant 0 : index
    %c0_7 = arith.constant 0 : index
    %3 = vector.load %arg1[%c0_5, %c0_6, %c0_7] : memref<2x40x64xf32, #tpu.memory_space<vmem>>, vector<1x40x64xf32>
    %4 = vector.shape_cast %3 : vector<1x40x64xf32> to vector<40x64xf32>
    %cst = arith.constant dense<0.000000e+00> : vector<16x64xf32>
    %5 = tpu.matmul %0, %4, %cst {dimension_numbers = #tpu.dot_dimension_numbers<[1], [0], [0], [1], [0, 0, 1, 1], [], []>} : vector<16x40xf32>, vector<40x64xf32>, vector<16x64xf32> -> vector<16x64xf32>
    %cst_8 = arith.constant 0.000000e+00 : f32
    %6 = vector.broadcast %cst_8 : f32 to vector<16x64xf32>
    %7 = arith.maximumf %5, %6 : vector<16x64xf32>
    %cst_9 = arith.constant dense<0.000000e+00> : vector<3x64xf32>
    %8 = tpu.matmul %1, %7, %cst_9 {dimension_numbers = #tpu.dot_dimension_numbers<[1], [0], [0], [1], [0, 0, 1, 1], [], []>} : vector<3x16xf32>, vector<16x64xf32>, vector<3x64xf32> -> vector<3x64xf32>
    %cst_10 = arith.constant dense<0.000000e+00> : vector<3x256xf32>
    %9 = tpu.matmul %8, %2, %cst_10 {dimension_numbers = #tpu.dot_dimension_numbers<[1], [0], [0], [1], [0, 0, 1, 1], [], []>} : vector<3x64xf32>, vector<64x256xf32>, vector<3x256xf32> -> vector<3x256xf32>
    %c0_11 = arith.constant 0 : index
    %c0_12 = arith.constant 0 : index
    %c0_13 = arith.constant 0 : index
    %10 = vector.load %arg5[%c0_11, %c0_12, %c0_13] : memref<2x3x256xf32, #tpu.memory_space<vmem>>, vector<1x3x256xf32>
    %11 = vector.shape_cast %10 : vector<1x3x256xf32> to vector<3x256xf32>
    %12 = vector.shape_cast %9 : vector<3x256xf32> to vector<1x3x256xf32>
    tpu.vector_store %arg5[%c0_11, %c0_12, %c0_13], %12 {strides = array<i32>} : memref<2x3x256xf32, #tpu.memory_space<vmem>>, vector<1x3x256xf32>,
    %c1 = arith.constant 1 : index
    %c0_14 = arith.constant 0 : index
    %c0_15 = arith.constant 0 : index
    %13 = vector.load %arg1[%c1, %c0_14, %c0_15] : memref<2x40x64xf32, #tpu.memory_space<vmem>>, vector<1x40x64xf32>
    %14 = vector.shape_cast %13 : vector<1x40x64xf32> to vector<40x64xf32>
    %cst_16 = arith.constant dense<0.000000e+00> : vector<16x64xf32>
    %15 = tpu.matmul %0, %14, %cst_16 {dimension_numbers = #tpu.dot_dimension_numbers<[1], [0], [0], [1], [0, 0, 1, 1], [], []>} : vector<16x40xf32>, vector<40x64xf32>, vector<16x64xf32> -> vector<16x64xf32>
    %cst_17 = arith.constant 0.000000e+00 : f32
    %16 = vector.broadcast %cst_17 : f32 to vector<16x64xf32>
    %17 = arith.maximumf %15, %16 : vector<16x64xf32>
    %cst_18 = arith.constant dense<0.000000e+00> : vector<3x64xf32>
    %18 = tpu.matmul %1, %17, %cst_18 {dimension_numbers = #tpu.dot_dimension_numbers<[1], [0], [0], [1], [0, 0, 1, 1], [], []>} : vector<3x16xf32>, vector<16x64xf32>, vector<3x64xf32> -> vector<3x64xf32>
    %cst_19 = arith.constant dense<0.000000e+00> : vector<3x256xf32>
    %19 = tpu.matmul %18, %2, %cst_19 {dimension_numbers = #tpu.dot_dimension_numbers<[1], [0], [0], [1], [0, 0, 1, 1], [], []>} : vector<3x64xf32>, vector<64x256xf32>, vector<3x256xf32> -> vector<3x256xf32>
    %c1_20 = arith.constant 1 : index
    %c0_21 = arith.constant 0 : index
    %c0_22 = arith.constant 0 : index
    %20 = vector.load %arg5[%c1_20, %c0_21, %c0_22] : memref<2x3x256xf32, #tpu.memory_space<vmem>>, vector<1x3x256xf32>
    %21 = vector.shape_cast %20 : vector<1x3x256xf32> to vector<3x256xf32>
    %22 = vector.shape_cast %19 : vector<3x256xf32> to vector<1x3x256xf32>
    tpu.vector_store %arg5[%c1_20, %c0_21, %c0_22], %22 {strides = array<i32>} : memref<2x3x256xf32, #tpu.memory_space<vmem>>, vector<1x3x256xf32>,
    return
  }
  func.func @transform_0(%arg0: i32) -> (i32, i32, i32) {
    %c0_i32 = arith.constant 0 : i32
    %c0_i32_0 = arith.constant 0 : i32
    %c0_i32_1 = arith.constant 0 : i32
    return %arg0, %c0_i32, %c0_i32_0 : i32, i32, i32
  }
  func.func @transform_1(%arg0: i32) -> (i32, i32) {
    %c0_i32 = arith.constant 0 : i32
    %c0_i32_0 = arith.constant 0 : i32
    %c0_i32_1 = arith.constant 0 : i32
    return %c0_i32, %c0_i32_0 : i32, i32
  }
  func.func @transform_2(%arg0: i32) -> (i32, i32) {
    %c0_i32 = arith.constant 0 : i32
    %c0_i32_0 = arith.constant 0 : i32
    %c0_i32_1 = arith.constant 0 : i32
    return %c0_i32, %c0_i32_0 : i32, i32
  }
  func.func @transform_3(%arg0: i32) -> (i32, i32) {
    %c0_i32 = arith.constant 0 : i32
    %c0_i32_0 = arith.constant 0 : i32
    %c0_i32_1 = arith.constant 0 : i32
    return %c0_i32, %c0_i32_0 : i32, i32
  }
  func.func @transform_4(%arg0: i32) -> (i32, i32, i32) {
    %c0_i32 = arith.constant 0 : i32
    %c0_i32_0 = arith.constant 0 : i32
    %c0_i32_1 = arith.constant 0 : i32
    return %arg0, %c0_i32, %c0_i32_0 : i32, i32, i32
  }
}

</mosaic_0001>

<bundles_post_ra>
// kernel: tpu_custom_call.1
= control target key start
LH: loop header
LB: loop body
LE: loop exit
PB: predicated region body
PF: predicated region fallthrough
CT: control target
= control target key end

     0   :  { %9 = vsyncpa [#allocation3], 0  ;;  %s873_s0 = inlined_call_operand.hbm [shape: f32[2,40,64], index: 0, kind: input, shape index: {}]   ;;  %s874_s1 = inlined_call_operand.hbm [shape: f32[16,40], index: 1, kind: input, shape index: {}]   ;;  %s875_s2 = inlined_call_operand.vmem [shape: f32[3,16], index: 2, kind: input, shape index: {}]   ;;  %s876_s3 = inlined_call_operand.hbm [shape: f32[64,256], index: 3, kind: input, shape index: {}]   ;;  %s877_s4 = inlined_call_operand.vmem [shape: f32[2,3,256], index: 4, kind: output, shape index: {}]  }
   0x1   :  { %10 = vsyncpa [#allocation5], 0  ;;  %s762_s15 = smov [#allocation4]   ;;  %s763_s17 = smov [#allocation2]  }
   0x2   :  { %s28_s16 = sshll.u32 %s762_s15, 4  ;;  %s16_s18 = sshll.u32 %s763_s17, 4  ;;  %s29_s16 = int_to_ptr.vmem [resolvable:$true] %s28_s16  ;;  %s797_s18 = int_to_ptr.vmem [resolvable:$true] %s16_s18 }
   0x3   :  { %s692_s21 = scalar_lea.hbm %s874_s1, 256 }
   0x4   :  { %p693_p0 = scmp.ne.s32.totalorder %s874_s1, %s692_s21  ;;  %p696_p1 = scmp.lt.u32.totalorder %s692_s21, %s874_s1 }
   0x6   :  { %p698_p2 = pnand %p696_p1, %p693_p0 }
   0x8   :  { %701 = shalt.err (!%p698_p2)
}
   0x9   :  { %s702_s26 = scalar_lea.vmem %s29_s16, 256  ;;  %p707_p4 = scmp.lt.s32.totalorder %s29_s16, %s29_s16 }
   0xa   :  { %p703_p3 = scmp.ne.s32.totalorder %s29_s16, %s702_s26  ;;  %p708_p5 = scmp.lt.s32.totalorder %s702_s26, %s702_s26 }
   0xc   :  { %p709_p6 = por %p708_p5, %p707_p4 }
   0xe   :  { %p710_p7 = pnand %p709_p6, %p703_p3 }
  0x10   :  { %713 = shalt.err (!%p710_p7)
}
  0x11   :  { %s764_s27 = smov 128   ;;  %s765_s28 = smov 8  }
  0x12   :  { %34 = dma.hbm_to_vmem [thread:$0]  %s874_s1, 256, %s29_s16, [#allocation5], %s764_s27, %s764_s27, %s765_s28  }
  0x13   :  { %s714_s7 = scalar_lea.hbm %s873_s0, 1280 }
  0x14   :  { %p715_p8 = scmp.ne.s32.totalorder %s873_s0, %s714_s7  ;;  %p718_p9 = scmp.lt.u32.totalorder %s714_s7, %s873_s0 }
  0x16   :  { %p720_p10 = pnand %p718_p9, %p715_p8 }
  0x18   :  { %723 = shalt.err (!%p720_p10)
}
  0x19   :  { %s724_s12 = scalar_lea.vmem %s797_s18, 1280  ;;  %p729_p12 = scmp.lt.s32.totalorder %s797_s18, %s797_s18 }
  0x1a   :  { %p725_p11 = scmp.ne.s32.totalorder %s797_s18, %s724_s12  ;;  %p730_p13 = scmp.lt.s32.totalorder %s724_s12, %s724_s12 }
  0x1c   :  { %p731_p0 = por %p730_p13, %p729_p12 }
  0x1e   :  { %p732_p1 = pnand %p731_p0, %p725_p11 }
  0x20   :  { %735 = shalt.err (!%p732_p1)
}
  0x21   :  { %22 = dma.hbm_to_vmem [thread:$0]  %s873_s0, 1280, %s797_s18, [#allocation3], %s764_s27, %s764_s27, %s765_s28  }
  0x22   :  { %s766_s14 = smov [#allocation6]   ;;  %s736_s19 = scalar_lea.hbm %s876_s3, 2048 }
  0x23   :  { %s42_s15 = sshll.u32 %s766_s14, 4  ;;  %p737_p2 = scmp.ne.s32.totalorder %s876_s3, %s736_s19  ;;  %s43_s15 = int_to_ptr.vmem [resolvable:$true] %s42_s15 }
  0x24   :  { %p740_p3 = scmp.lt.u32.totalorder %s736_s19, %s876_s3 }
  0x26   :  { %p742_p4 = pnand %p740_p3, %p737_p2 }
  0x28   :  { %745 = shalt.err (!%p742_p4)
}
  0x29   :  { %s746_s24 = scalar_lea.vmem %s43_s15, 2048  ;;  %p751_p6 = scmp.lt.s32.totalorder %s43_s15, %s43_s15 }
  0x2a   :  { %p747_p5 = scmp.ne.s32.totalorder %s43_s15, %s746_s24  ;;  %p752_p7 = scmp.lt.s32.totalorder %s746_s24, %s746_s24 }
  0x2c   :  { %p753_p8 = por %p752_p7, %p751_p6 }
  0x2e   :  { %p754_p9 = pnand %p753_p8, %p747_p5 }
  0x30   :  { %757 = shalt.err (!%p754_p9)
}
  0x31   :  { %s767_s0 = smov 256   ;;  %s768_s18 = smov 16  }
  0x32   :  { %48 = dma.hbm_to_vmem [thread:$0]  %s876_s3, 2048, %s43_s15, [#allocation5], %s767_s0, %s767_s0, %s768_s18  }
  0x33   :  { %758 = dma.done.wait [#allocation3], 1280  }
  0x34   :  { %759 = vsyncadd [#allocation3], 4294966016 }
  0x35   :  { %760 = dma.done.wait [#allocation5], 2304  }
  0x36   :  { %761 = vsyncadd [#allocation5], 4294964992  ;;  %vm82_vm0 = vcmask 326656   ;;  %v77_v0 = vld [vmem:[#allocation2] sm:$0xff]  ;;  %v78_v1 = vld [vmem:[#allocation2 + $0x8] sm:$0xff]  ;;  %v769_v9 = vmov 0.0|0.0  }
  0x37   :  { %v79_v2 = vld [vmem:[#allocation2 + $0x10] sm:$0xff]  ;;  %v628_v3 = vpack.c.bf16 %v78_v1, %v77_v0  ;;  %v80_v4 = vld [vmem:[#allocation2 + $0x18] sm:$0xff]  ;;  %v81_v7 = vld [vmem:[#allocation2 + $0x20] sm:$0xff]  ;;  %vm770_vm1 = vmmov 0   ;;  %v771_v10 = vmov 0.0   ;;  %vm166_vm2 = vcmask 130048  }
  0x38   :  { %v840_v5 = vld [vmem:[#allocation4] sm:$0xff]  ;;  %v632_v6 = vpack.c.bf16 %v80_v4, %v79_v2  ;;  %v844_v8 = vld [vmem:[#allocation4 + $0x8] sm:$0xff]  ;;  %308 = vmatprep.mubr.f32.mxu1 %v771_v10  ;;  %v62_v11 = vld [vmem:[#allocation6 + $0x8] sm:$0xff]  ;;  %vm240_vm3 = vcmask 523264  }
  0x39   :  { %598 = vmatprep.mubr.msk.f32.mxu0 %vm82_vm0, %v840_v5  ;;  %629 = vmatprep.subr.bf16.mxu0 %v628_v3  ;;  %v64_v12 = vld [vmem:[#allocation6 + $0x18] sm:$0xff]  ;;  %v61_v13 = vld [vmem:[#allocation6] sm:$0xff]  ;;  %v63_v15 = vld [vmem:[#allocation6 + $0x10] sm:$0xff] }
  0x3a   :  { %631 = vmatpush3.bf16.msra.mxu0 %v628_v3  ;;  %v639_v14 = vpack.c.bf16 %v64_v12, %v62_v11  ;;  %v66_v16 = vld [vmem:[#allocation6 + $0x28] sm:$0xff]  ;;  %v68_v17 = vld [vmem:[#allocation6 + $0x38] sm:$0xff]  ;;  %v641_v18 = vpack.c.bf16 %v63_v15, %v61_v13  ;;  %v65_v20 = vld [vmem:[#allocation6 + $0x20] sm:$0xff] }
  0x3b   :  { %633 = vmatprep.subr.bf16.mxu0 %v632_v6  ;;  %v643_v19 = vpack.c.bf16 %v68_v17, %v66_v16  ;;  %v67_v21 = vld [vmem:[#allocation6 + $0x30] sm:$0xff]  ;;  %v70_v22 = vld [vmem:[#allocation6 + $0x48] sm:$0xff]  ;;  %v72_v23 = vld [vmem:[#allocation6 + $0x58] sm:$0xff] }
  0x3c   :  { %640 = vmatprep.subr.bf16.mxu1 %v639_v14  ;;  %v645_v24 = vpack.c.bf16 %v67_v21, %v65_v20  ;;  %v647_v25 = vpack.c.bf16 %v72_v23, %v70_v22  ;;  %v69_v26 = vld [vmem:[#allocation6 + $0x40] sm:$0xff]  ;;  %v71_v27 = vld [vmem:[#allocation6 + $0x50] sm:$0xff]  ;;  %v74_v28 = vld [vmem:[#allocation6 + $0x68] sm:$0xff] }
  0x3d   :  { %642 = vmatpush1.bf16.msra.mxu1 %v641_v18  ;;  %v76_v29 = vld [vmem:[#allocation6 + $0x78] sm:$0xff]  ;;  %v649_v30 = vpack.c.bf16 %v71_v27, %v69_v26  ;;  %v73_v32 = vld [vmem:[#allocation6 + $0x60] sm:$0xff]  ;;  %v75_v33 = vld [vmem:[#allocation6 + $0x70] sm:$0xff] }
  0x3e   :  { %635 = vmatpush3.bf16.msra.mxu0 %v632_v6  ;;  %644 = vmatprep.subr.bf16.mxu1 %v643_v19  ;;  %v651_v31 = vpack.c.bf16 %v76_v29, %v74_v28  ;;  %v653_v34 = vpack.c.bf16 %v75_v33, %v73_v32  ;;  %v321_v36 = vld [vmem:[#allocation2 + $0x28] sm:$0xff]  ;;  %v322_v37 = vld [vmem:[#allocation2 + $0x30] sm:$0xff]  ;;  %v323_v43 = vld [vmem:[#allocation2 + $0x38] sm:$0xff] }
  0x3f   :  { %596 = vmatprep.subr.mxu0 %v81_v7  ;;  %v655_v41 = vpack.c.bf16 %v322_v37, %v321_v36  ;;  %v324_v44 = vld [vmem:[#allocation2 + $0x40] sm:$0xff]  ;;  %v325_v47 = vld [vmem:[#allocation2 + $0x48] sm:$0xff] }
  0x40   :  { %v60_v45 = vld [vmem:[%s875_s2] sm:$0x7]  ;;  %v659_v46 = vpack.c.bf16 %v324_v44, %v323_v43 }
  0x41   :  { %646 = vmatpush1.bf16.msra.mxu1 %v645_v24 }
  0x42   :  { %597 = vmatpush3.msra.mxu0 %v81_v7  ;;  %648 = vmatprep.subr.bf16.mxu1 %v647_v25 }
  0x43   :  { %599 = vmatmul.mubr.msk.f32.vlgmr.msra.gmra.mrb[0].mxu0 %vm82_vm0, %v844_v8  ;;  %636 = vmatprep.subr.bf16.mxu0 %v769_v9 }
  0x44   :  { %605 = vmatprep.mubr.msk.f32.mxu0 %vm770_vm1, %v771_v10 }
  0x45   :  { %650 = vmatpush1.bf16.msra.mxu1 %v649_v30 }
  0x46   :  { %652 = vmatprep.subr.bf16.mxu1 %v651_v31 }
  0x49   :  { %654 = vmatpush1.bf16.msra.mxu1 %v653_v34 }
  0x4a   :  { %667 = vmatprep.subr.bf16.mxu1 %v639_v14 }
 0x116   :  { %v600_v35 = vpop.f32.mrb[0].mxu0 }
 0x117   :  { %v165_v38 = vmax.f32 %v600_v35, 0.0  ;;  %v155_v39 = vpop.f32.mrb[1].mxu0 }
 0x118   :  { %v164_v40 = vmax.f32 %v155_v39, 0.0 }
 0x11a   :  { %v637_v42 = vpack.c.bf16 %v165_v38, %v164_v40 }
 0x11c   :  { %638 = vmatpush3.bf16.msra.mxu0 %v637_v42 }
 0x11d   :  { %656 = vmatprep.subr.bf16.mxu0 %v655_v41 }
 0x11f   :  { %606 = vmatmul.mubr.msk.f32.vlgmr.msra.gmra.mrb[2].mxu0 %vm166_vm2, %v60_v45 }
 0x120   :  { %658 = vmatpush3.bf16.msra.mxu0 %v655_v41  ;;  %618 = vmatprep.mubr.msk.f32.mxu0 %vm82_vm0, %v840_v5 }
 0x121   :  { %660 = vmatprep.subr.bf16.mxu0 %v659_v46 }
 0x124   :  { %662 = vmatpush3.bf16.msra.mxu0 %v659_v46 }
 0x125   :  { %616 = vmatprep.subr.mxu0 %v325_v47 }
 0x128   :  { %617 = vmatpush3.msra.mxu0 %v325_v47 }
 0x129   :  { %619 = vmatmul.mubr.msk.f32.vlgmr.msra.gmra.mrb[4].mxu0 %vm82_vm0, %v844_v8  ;;  %663 = vmatprep.subr.bf16.mxu0 %v769_v9 }
 0x12a   :  { %625 = vmatprep.mubr.msk.f32.mxu0 %vm770_vm1, %v771_v10 }
 0x1f2   :  { %v236_v48 = vpop.f32.mrb[2].mxu0 }
 0x1f3   :  { %v607_v49 = vpop.f32.mrb[3].mxu0  ;;  %562 = vmatmul.mubr.msk.f32.vlgmr.msra.gmra.mrb[0].mxu1 %vm240_vm3, %v236_v48 }
 0x1f4   :  { %669 = vmatpush1.bf16.msra.mxu1 %v641_v18  ;;  %540 = vmatprep.mubr.f32.mxu1 %v771_v10 }
 0x1f5   :  { %671 = vmatprep.subr.bf16.mxu1 %v643_v19 }
 0x1f8   :  { %673 = vmatpush1.bf16.msra.mxu1 %v645_v24 }
 0x1f9   :  { %675 = vmatprep.subr.bf16.mxu1 %v647_v25 }
 0x1fc   :  { %v620_v50 = vpop.f32.mrb[4].mxu0  ;;  %677 = vmatpush1.bf16.msra.mxu1 %v649_v30 }
 0x1fd   :  { %v402_v51 = vmax.f32 %v620_v50, 0.0  ;;  %v392_v52 = vpop.f32.mrb[5].mxu0  ;;  %679 = vmatprep.subr.bf16.mxu1 %v651_v31 }
 0x1fe   :  { %v401_v53 = vmax.f32 %v392_v52, 0.0 }
 0x200   :  { %v664_v54 = vpack.c.bf16 %v402_v51, %v401_v53  ;;  %681 = vmatpush1.bf16.msra.mxu1 %v653_v34 }
 0x202   :  { %665 = vmatpush3.bf16.msra.mxu0 %v664_v54 }
 0x205   :  { %626 = vmatmul.mubr.msk.f32.vlgmr.msra.gmra.mrb[6].mxu0 %vm166_vm2, %v60_v45 }
 0x2c6   :  { %v310_v55 = vpop.f32.mrb[0].mxu1 }
 0x2c7   :  { %v312_v56 = vpop.f32.mrb[1].mxu1 }
 0x2c8   :  { %v317_v57 = vcombine.low %v310_v55, %v312_v56 }
 0x2ca   :  { %319 = vst [vmem:[%s877_s4] sm:$0x77] %v317_v57 }
 0x2d8   :  { %v469_v58 = vpop.f32.mrb[6].mxu0 }
 0x2d9   :  { %v627_v59 = vpop.f32.mrb[7].mxu0  ;;  %566 = vmatmul.mubr.msk.f32.vlgmr.msra.gmra.mrb[2].mxu1 %vm240_vm3, %v469_v58 }
 0x3ac   :  { %v542_v60 = vpop.f32.mrb[2].mxu1 }
 0x3ad   :  { %v544_v61 = vpop.f32.mrb[3].mxu1 }
 0x3ae   :  { %v549_v62 = vcombine.low %v542_v60, %v544_v61 }
 0x3b0   :  { %567 = vst [vmem:[%s877_s4 + $0x8] sm:$0x77] %v549_v62 }
 0x3b1   :  { %557 = vsyncpa [#allocation3], 1 }
 0x3b2   :  { %558 = vsyncpa [#allocation5], 1 }

</bundles_post_ra>
